<compile_context>
chip_gen: v6e
topology: v6e:2x2x1
jax: 0.10.0
libtpu: 0.0.40
codegen_flags: <defaults>
</compile_context>

<pallas_src>
import functools

import jax
import jax.numpy as jnp
from jax.experimental import pallas as pl
from jax.experimental.pallas import tpu as pltpu

# Standard CapsNet hyper-parameters (args.m_plus / args.m_minus / args.lambda_val)
M_PLUS = 0.9
M_MINUS = 0.1
LAMBDA_VAL = 0.5


def _margin_loss_kernel(v_ref, t_ref, o_ref, *, m_plus, m_minus, lambda_val,
                        true_b, inv_b):
    # v_ref: (TB, C) float   -- batch on sublanes, classes on lanes.
    # t_ref: (TB, 1) int32   -- per-row class label.
    # o_ref: (1, 1) float32  -- resident accumulator (constant index_map).
    i = pl.program_id(0)

    @pl.when(i == 0)
    def _init():
        o_ref[...] = jnp.zeros_like(o_ref)

    v = v_ref[...].astype(jnp.float32)          # single upcast (input may be bf16)
    t = t_ref[...]                              # (TB, 1)
    tb, c = v.shape

    cls_idx = jax.lax.broadcasted_iota(jnp.int32, (tb, c), dimension=1)

    present = jnp.maximum(m_plus - v, 0.0)
    absent = jnp.maximum(v - m_minus, 0.0)

    # One-hot collapsed into a single select — the float one-hot never exists.
    l_c = jnp.where(cls_idx == t, present * present,
                    lambda_val * (absent * absent))

    # Mask ragged-tail rows (global batch index >= true_b). Select, not
    # arithmetic, so undefined pad-region data (incl. NaN) is harmless.
    row_idx = jax.lax.broadcasted_iota(jnp.int32, (tb, c), dimension=0) + i * tb
    l_c = jnp.where(row_idx < true_b, l_c, 0.0)

    # Class (lane) reduce then batch (sublane) reduce -> (1, 1) partial; both
    # go to the XLU slot, which is idle here.
    partial = jnp.sum(jnp.sum(l_c, axis=1, keepdims=True), axis=0, keepdims=True)
    o_ref[...] += partial

    @pl.when(i == pl.num_programs(0) - 1)
    def _finalize():
        # mean over the true batch: static 1/B multiply, no divide.
        o_ref[...] = o_ref[...] * inv_b


def margin_loss(v_c, target, *, m_plus=M_PLUS, m_minus=M_MINUS,
                lambda_val=LAMBDA_VAL, block_b=8192):
    """v_c: (B, num_classes) float, target: (B,) int -> scalar float32 loss."""
    v_c = jnp.asarray(v_c)
    b, c = v_c.shape

    # Label column (B, 1): batch on sublanes, matching v_c's block layout.
    t_col = jnp.asarray(target, dtype=jnp.int32).reshape(b, 1)

    if b <= int(block_b):
        # Whole-array block: always layout-legal, single grid step.
        tb = b
    else:
        # Sublane-aligned batch tile (robust even for odd user block_b).
        tb = max(8, (int(block_b) // 8) * 8)
    grid_steps = pl.cdiv(b, tb)

    kernel = functools.partial(
        _margin_loss_kernel,
        m_plus=float(m_plus),
        m_minus=float(m_minus),
        lambda_val=float(lambda_val),
        true_b=int(b),
        inv_b=1.0 / float(b),
    )

    out = pl.pallas_call(
        kernel,
        out_shape=jax.ShapeDtypeStruct((1, 1), jnp.float32),
        grid=(grid_steps,),
        in_specs=[
            pl.BlockSpec((tb, c), lambda i: (i, 0)),   # v_c     (TB, C)
            pl.BlockSpec((tb, 1), lambda i: (i, 0)),   # target  (TB, 1)
        ],
        # Constant index map => output block resident across the grid (acc).
        out_specs=pl.BlockSpec((1, 1), lambda i: (0, 0)),
        compiler_params=pltpu.CompilerParams(
            dimension_semantics=("arbitrary",)),       # sequential accumulation
    )(v_c, t_col)

    return out[0, 0]


def _reference_margin_loss(v_c, target, num_classes):
    labels = jax.nn.one_hot(target, num_classes, dtype=jnp.float32)
    present = jnp.maximum(M_PLUS - v_c, 0.0) ** 2
    absent = jnp.maximum(v_c - M_MINUS, 0.0) ** 2
    l_c = labels * present + LAMBDA_VAL * (1.0 - labels) * absent
    return jnp.mean(jnp.sum(l_c, axis=1))


if __name__ == "__main__":
    key = jax.random.PRNGKey(0)
    k_v, k_t, k_v2, k_t2 = jax.random.split(key, 4)

    # Small test (module-consistent shapes): batch=2, num_classes=10.
    batch, num_classes = 2, 10
    v_c = jax.random.uniform(k_v, (batch, num_classes), dtype=jnp.float32)
    target = jax.random.randint(k_t, (batch,), 0, num_classes, dtype=jnp.int32)

    loss = jax.block_until_ready(margin_loss(v_c, target))
    ref = jax.block_until_ready(_reference_margin_loss(v_c, target, num_classes))
    assert jnp.allclose(loss, ref, rtol=1e-5, atol=1e-6), (loss, ref)

    # Tiny second check exercising the multi-block + ragged-tail + accumulator
    # path (batch=20, tile=8 -> grid of 3, last block masked).
    batch2 = 20
    v_c2 = jax.random.uniform(k_v2, (batch2, num_classes), dtype=jnp.float32)
    target2 = jax.random.randint(k_t2, (batch2,), 0, num_classes, dtype=jnp.int32)
    loss2 = jax.block_until_ready(margin_loss(v_c2, target2, block_b=8))
    ref2 = jax.block_until_ready(_reference_margin_loss(v_c2, target2, num_classes))
    assert jnp.allclose(loss2, ref2, rtol=1e-5, atol=1e-6), (loss2, ref2)

    print("KERNEL_OK")
</pallas_src>

<mosaic_0001>
module attributes {stable_mosaic.version = 11 : i64} {
  func.func @_margin_loss_kernel(%arg0: i32, %arg1: memref<2x10xf32, #tpu.memory_space<vmem>>, %arg2: memref<2x1xi32, #tpu.memory_space<vmem>>, %arg3: memref<1x1xf32, #tpu.memory_space<vmem>>) attributes {dimension_semantics = [#tpu.dimension_semantics<arbitrary>], iteration_bounds = array<i64: 1>, scalar_prefetch = 0 : i64, scratch_operands = 0 : i64, tpu.core_type = #tpu.core_type<tc>, window_params = [{transform_indices = @transform_0, window_bounds = array<i64: 2, 10>}, {transform_indices = @transform_1, window_bounds = array<i64: 2, 1>}, {pipeline_mode = #tpu.pipeline_mode<synchronous>, transform_indices = @transform_2, window_bounds = array<i64: 1, 1>}]} {
    %c0_i32 = arith.constant 0 : i32
    %0 = arith.cmpi eq, %arg0, %c0_i32 : i32
    %1 = arith.extui %0 : i1 to i32
    %c0_i32_0 = arith.constant 0 : i32
    %2 = arith.cmpi ne, %1, %c0_i32_0 : i32
    scf.if %2 {
      %cst_18 = arith.constant 0.000000e+00 : f32
      %39 = vector.broadcast %cst_18 : f32 to vector<1x1xf32>
      %c0_19 = arith.constant 0 : index
      %c0_20 = arith.constant 0 : index
      %40 = vector.load %arg3[%c0_19, %c0_20] : memref<1x1xf32, #tpu.memory_space<vmem>>, vector<1x1xf32>
      tpu.vector_store %arg3[%c0_19, %c0_20], %39 {strides = array<i32>} : memref<1x1xf32, #tpu.memory_space<vmem>>, vector<1x1xf32>,
    } else {
    }
    %c0 = arith.constant 0 : index
    %c0_1 = arith.constant 0 : index
    %3 = vector.load %arg1[%c0, %c0_1] : memref<2x10xf32, #tpu.memory_space<vmem>>, vector<2x10xf32>
    %c0_2 = arith.constant 0 : index
    %c0_3 = arith.constant 0 : index
    %4 = vector.load %arg2[%c0_2, %c0_3] : memref<2x1xi32, #tpu.memory_space<vmem>>, vector<2x1xi32>
    %5 = tpu.iota {dimensions = array<i32: 1>} : vector<2x10xi32>
    %cst = arith.constant 0.899999976 : f32
    %6 = vector.broadcast %cst : f32 to vector<2x10xf32>
    %7 = arith.subf %6, %3 : vector<2x10xf32>
    %cst_4 = arith.constant 0.000000e+00 : f32
    %8 = vector.broadcast %cst_4 : f32 to vector<2x10xf32>
    %9 = arith.maximumf %7, %8 : vector<2x10xf32>
    %cst_5 = arith.constant 1.000000e-01 : f32
    %10 = vector.broadcast %cst_5 : f32 to vector<2x10xf32>
    %11 = arith.subf %3, %10 : vector<2x10xf32>
    %cst_6 = arith.constant 0.000000e+00 : f32
    %12 = vector.broadcast %cst_6 : f32 to vector<2x10xf32>
    %13 = arith.maximumf %11, %12 : vector<2x10xf32>
    %14 = vector.broadcast %4 : vector<2x1xi32> to vector<2x10xi32>
    %15 = arith.cmpi eq, %5, %14 : vector<2x10xi32>
    %16 = arith.mulf %9, %9 : vector<2x10xf32>
    %17 = arith.mulf %13, %13 : vector<2x10xf32>
    %cst_7 = arith.constant 5.000000e-01 : f32
    %18 = vector.broadcast %cst_7 : f32 to vector<2x10xf32>
    %19 = arith.mulf %18, %17 : vector<2x10xf32>
    %20 = arith.select %15, %16, %19 : vector<2x10xi1>, vector<2x10xf32>
    %21 = tpu.iota {dimensions = array<i32: 0>} : vector<2x10xi32>
    %c2_i32 = arith.constant 2 : i32
    %22 = arith.muli %arg0, %c2_i32 : i32
    %23 = vector.broadcast %22 : i32 to vector<2x10xi32>
    %24 = arith.addi %21, %23 : vector<2x10xi32>
    %c2_i32_8 = arith.constant 2 : i32
    %25 = vector.broadcast %c2_i32_8 : i32 to vector<2x10xi32>
    %26 = arith.cmpi slt, %24, %25 : vector<2x10xi32>
    %cst_9 = arith.constant 0.000000e+00 : f32
    %27 = vector.broadcast %cst_9 : f32 to vector<2x10xf32>
    %28 = arith.select %26, %20, %27 : vector<2x10xi1>, vector<2x10xf32>
    %cst_10 = arith.constant dense<0.000000e+00> : vector<2xf32>
    %29 = vector.multi_reduction <add>, %28, %cst_10 [1] : vector<2x10xf32> to vector<2xf32>
    %30 = vector.shape_cast %29 : vector<2xf32> to vector<2x1xf32>
    %cst_11 = arith.constant dense<0.000000e+00> : vector<1xf32>
    %31 = vector.multi_reduction <add>, %30, %cst_11 [0] : vector<2x1xf32> to vector<1xf32>
    %32 = vector.shape_cast %31 : vector<1xf32> to vector<1x1xf32>
    %c0_12 = arith.constant 0 : index
    %c0_13 = arith.constant 0 : index
    %33 = vector.load %arg3[%c0_12, %c0_13] : memref<1x1xf32, #tpu.memory_space<vmem>>, vector<1x1xf32>
    %34 = arith.addf %33, %32 : vector<1x1xf32>
    %c0_14 = arith.constant 0 : index
    %c0_15 = arith.constant 0 : index
    %35 = vector.load %arg3[%c0_14, %c0_15] : memref<1x1xf32, #tpu.memory_space<vmem>>, vector<1x1xf32>
    tpu.vector_store %arg3[%c0_14, %c0_15], %34 {strides = array<i32>} : memref<1x1xf32, #tpu.memory_space<vmem>>, vector<1x1xf32>,
    %c0_i32_16 = arith.constant 0 : i32
    %36 = arith.cmpi eq, %arg0, %c0_i32_16 : i32
    %37 = arith.extui %36 : i1 to i32
    %c0_i32_17 = arith.constant 0 : i32
    %38 = arith.cmpi ne, %37, %c0_i32_17 : i32
    scf.if %38 {
      %c0_18 = arith.constant 0 : index
      %c0_19 = arith.constant 0 : index
      %39 = vector.load %arg3[%c0_18, %c0_19] : memref<1x1xf32, #tpu.memory_space<vmem>>, vector<1x1xf32>
      %cst_20 = arith.constant 5.000000e-01 : f32
      %40 = vector.broadcast %cst_20 : f32 to vector<1x1xf32>
      %41 = arith.mulf %39, %40 : vector<1x1xf32>
      %c0_21 = arith.constant 0 : index
      %c0_22 = arith.constant 0 : index
      %42 = vector.load %arg3[%c0_21, %c0_22] : memref<1x1xf32, #tpu.memory_space<vmem>>, vector<1x1xf32>
      tpu.vector_store %arg3[%c0_21, %c0_22], %41 {strides = array<i32>} : memref<1x1xf32, #tpu.memory_space<vmem>>, vector<1x1xf32>,
    } else {
    }
    return
  }
  func.func @transform_0(%arg0: i32) -> (i32, i32) {
    %c0_i32 = arith.constant 0 : i32
    %c0_i32_0 = arith.constant 0 : i32
    return %arg0, %c0_i32 : i32, i32
  }
  func.func @transform_1(%arg0: i32) -> (i32, i32) {
    %c0_i32 = arith.constant 0 : i32
    %c0_i32_0 = arith.constant 0 : i32
    return %arg0, %c0_i32 : i32, i32
  }
  func.func @transform_2(%arg0: i32) -> (i32, i32) {
    %c0_i32 = arith.constant 0 : i32
    %c0_i32_0 = arith.constant 0 : i32
    %c0_i32_1 = arith.constant 0 : i32
    return %c0_i32, %c0_i32_0 : i32, i32
  }
}

</mosaic_0001>

<bundles_post_ra>
// kernel: tpu_custom_call.1
= control target key start
LH: loop header
LB: loop body
LE: loop exit
PB: predicated region body
PF: predicated region fallthrough
CT: control target
= control target key end

     0   :  { %v104_v1 = vmov 0   ;;  %s134_s0 = inlined_call_operand.vmem [shape: f32[2,10], index: 0, kind: input, shape index: {}]   ;;  %s135_s1 = inlined_call_operand.vmem [shape: s32[2,1], index: 1, kind: input, shape index: {}]   ;;  %s136_s2 = inlined_call_operand.hbm [shape: f32[1,1], index: 2, kind: output, shape index: {}]  }
   0x1   :  { %v19_v0 = vld [vmem:[%s135_s1] sm:$0x3]  ;;  %81 = vset.pattern.permute.xlu0 %v104_v1 }
   0x2   :  { %7 = vsyncpa [#allocation3], 0  ;;  %27 = vperm.xlu0 %81, %v19_v0   ;;  %v18_v2 = vld [vmem:[%s134_s0] sm:$0x3]  ;;  %v20_v6 = vlaneseq  ;;  %vm41_vm2 = vcmask 74752   ;;  %vm16_vm3 = vcmask 0  }
   0x3   :  { %v77_v3 = vadd.f32 -0.1, %v18_v2  ;;  %v22_v4 = vsub.f32 0.9, %v18_v2  ;;  %v105_v17 = vmov 0.0   ;;  %vm45_vm4 = vcmask 1041408  }
   0x4   :  { %v35_v9 = vshrl.u32 %v20_v6, 7  ;;  %v21_v10 = vand.u32 127, %v20_v6  ;;  %17 = vst.msk [vmem:[#allocation2] sm:$0x1] %vm16_vm3, %v105_v17  ;;  %s106_s0 = smov [#allocation2]  }
   0x5   :  { %v25_v5 = vmax.f32 %v77_v3, 0.0  ;;  %v23_v7 = vmax.f32 %v22_v4, 0.0  ;;  %s69_s1 = sshll.u32 %s106_s0, 4  ;;  %s70_s1 = int_to_ptr.vmem [resolvable:$true] %s69_s1 }
   0x6   :  { %vm39_vm0 = vcmp.lt.s32.totalorder %v35_v9, 2  ;;  %s82_s13 = scalar_lea.vmem %s70_s1, 16  ;;  %s86_s14 = scalar_lea.vmem %s70_s1, 32 }
   0x7   :  { %v31_v8 = vmul.f32 %v25_v5, %v25_v5  ;;  %v30_v11 = vmul.f32 %v23_v7, %v23_v7  ;;  %p83_p0 = scmp.ne.s32.totalorder %s70_s1, %s82_s13  ;;  %p87_p1 = scmp.lt.s32.totalorder %s70_s1, %s70_s1 }
   0x8   :  { %p88_p2 = scmp.lt.s32.totalorder %s86_s14, %s82_s13 }
   0x9   :  { %v32_v12 = vmul.f32 0.5, %v31_v8 }
   0xa   :  { %p89_p3 = por %p88_p2, %p87_p1 }
   0xb   :  { %v53_v25 = vld [vmem:[#allocation2] sm:$0x1] }
   0xc   :  { %p90_p4 = pnand %p89_p3, %p83_p0 }
  0x7d   :  { %v28_v13 = vpop.permute.xlu0 %27 }
  0x7e   :  { %vm29_vm1 = vcmp.eq.s32.totalorder %v21_v10, %v28_v13 }
  0x7f   :  { %v33_v14 = vsel %vm29_vm1, %v30_v11, %v32_v12 }
  0x80   :  { %v40_v15 = vsel %vm39_vm0, %v33_v14, 0.0 }
  0x81   :  { %v42_v16 = vsel %vm41_vm2, %v40_v15, 0.0 }
  0x82   :  { %43 = vadd.xlane.f32.xlu0 %v42_v16 }
 0x10b   :  { %v44_v18 = vpop.xlane.xlu0 %43 }
 0x10c   :  { %v46_v19 = vsel %vm45_vm4, %v44_v18, 0.0 }
 0x10d   :  { %v47_v20 = vrot.slane %v46_v19, 4 }
 0x10f   :  { %v48_v21 = vadd.f32 %v47_v20, %v46_v19 }
 0x111   :  { %v49_v22 = vrot.slane %v48_v21, 2 }
 0x113   :  { %v50_v23 = vadd.f32 %v49_v22, %v48_v21 }
 0x115   :  { %v51_v24 = vrot.slane %v50_v23, 1 }
 0x117   :  { %v52_v26 = vadd.f32 %v51_v24, %v50_v23 }
 0x119   :  { %v54_v27 = vadd.f32 %v53_v25, %v52_v26 }
 0x11b   :  { %56 = vst.msk [vmem:[#allocation2] sm:$0x1] %vm16_vm3, %v54_v27 }
 0x122   :  { %v60_v28 = vld [vmem:[#allocation2] sm:$0x1] }
 0x123   :  { %v61_v29 = vmul.f32 0.5, %v60_v28 }
 0x125   :  { %62 = vst.msk [vmem:[#allocation2] sm:$0x1] %vm16_vm3, %v61_v29 }
 0x126   :  { %93 = shalt.err (!%p90_p4)
}
 0x127   :  { %72 = dma.vmem_to_hbm [thread:$0]  %s70_s1, 16, %s136_s2, [#allocation3]  }
 0x128   :  { %102 = dma.done.wait [#allocation3], 16  }
 0x129   :  { %103 = vsyncadd [#allocation3], 4294967280 }
 0x12a   :  { %76 = vsyncpa [#allocation3], 1 }

</bundles_post_ra>
